<compile_context>
chip_gen: v7x
topology: tpu7x:2x2x1
jax: 0.10.0
libtpu: 0.0.40
codegen_flags: <defaults>
</compile_context>

<pallas_src>
import functools

import jax
import jax.numpy as jnp
from jax.experimental import pallas as pl
from jax.experimental.pallas import tpu as pltpu


def _gcs_loss_kernel(pred_ref, truth_ref, out_ref, colx_acc, coly_acc,
                     *, total_batch, points):
    """Accumulate per-column sums of centered squared differences; finalize at end."""
    i = pl.program_id(0)
    n_steps = pl.num_programs(0)
    tb = pred_ref.shape[0]          # batch-tile size (static)
    P = points

    @pl.when(i == 0)
    def _init():
        colx_acc[...] = jnp.zeros_like(colx_acc)
        coly_acc[...] = jnp.zeros_like(coly_acc)

    # Single fused pass over memory: one (TB, 2P) difference for both halves.
    d = pred_ref[...].astype(jnp.float32) - truth_ref[...].astype(jnp.float32)
    dx = d[:, :P]                    # static lane slices, no extra HBM traffic
    dy = d[:, P:]

    inv_p = jnp.float32(1.0 / P)
    dxc = dx - jnp.sum(dx, axis=1, keepdims=True) * inv_p   # per-row centering
    dyc = dy - jnp.sum(dy, axis=1, keepdims=True) * inv_p

    if total_batch % tb != 0:
        # Ragged last batch tile: zero out padded rows (only emitted when needed).
        row = i * tb + jax.lax.broadcasted_iota(jnp.int32, (tb, 1), 0)
        valid = row < total_batch
        dxc = jnp.where(valid, dxc, 0.0)
        dyc = jnp.where(valid, dyc, 0.0)

    colx_acc[...] += jnp.sum(dxc * dxc, axis=0, keepdims=True)   # (1, P)
    coly_acc[...] += jnp.sum(dyc * dyc, axis=0, keepdims=True)   # (1, P)

    @pl.when(i == n_steps - 1)
    def _finalize():
        cx = colx_acc[...]                       # (1, P): sum_b Dc_x[b,ix]^2
        cy = coly_acc[...]
        sx = jnp.sum(cx)                         # total sum(Dc_x^2)
        sy = jnp.sum(cy)
        fp = jnp.float32(P)
        # dist(ix)^2 = sum(Dc^2) + P * colsum(Dc^2)[ix]   (all terms >= 0)
        total = jnp.sum(jnp.sqrt(sx + fp * cx)) + jnp.sum(jnp.sqrt(sy + fp * cy))
        out_ref[0, 0] = total / jnp.float32(2.0 * total_batch)


def gcs_loss(pred, truth, *, block_batch=None):
    """pred, truth: (B, 2P) arrays. Returns scalar loss (float32)."""
    pred = jnp.asarray(pred, jnp.float32)
    truth = jnp.asarray(truth, jnp.float32)
    assert pred.shape == truth.shape, "pred/truth shape mismatch"
    B, twoP = pred.shape
    assert twoP % 2 == 0, "feature dimension must be even (X/Y halves)"
    P = twoP // 2

    if block_batch is None:
        # Cap each input block at ~2 MiB f32 so 2 inputs x 2 pipeline buffers stay
        # well under the scoped-VMEM default on every chip (v5e 16 MiB, v7x 32 MiB).
        cap = max(8, (((2 << 20) // (twoP * 4)) // 8) * 8)
        block_batch = B if B <= cap else cap
    TB = int(block_batch)
    n_steps = pl.cdiv(B, TB)

    kernel = functools.partial(_gcs_loss_kernel, total_batch=B, points=P)

    out = pl.pallas_call(
        kernel,
        out_shape=jax.ShapeDtypeStruct((1, 1), jnp.float32),
        grid_spec=pltpu.PrefetchScalarGridSpec(
            num_scalar_prefetch=0,
            grid=(n_steps,),
            in_specs=[
                pl.BlockSpec((TB, twoP), lambda i: (i, 0)),
                pl.BlockSpec((TB, twoP), lambda i: (i, 0)),
            ],
            out_specs=pl.BlockSpec(memory_space=pltpu.MemorySpace.SMEM),
            scratch_shapes=[
                pltpu.VMEM((1, P), jnp.float32),   # colsum(Dc_x^2)
                pltpu.VMEM((1, P), jnp.float32),   # colsum(Dc_y^2)
            ],
        ),
        compiler_params=pltpu.CompilerParams(
            dimension_semantics=("arbitrary",),    # sequential batch reduction
        ),
    )(pred, truth)
    # TODO(synk): on v7x a per-tile partial-output ("parallel") formulation could
    # use both TensorCores; the sequential accumulation is kept for simplicity.
    return out[0, 0]


def _gcs_loss_ref(pred, truth):
    """Pure-JAX reference mirroring the PyTorch loop, for verification."""
    B, twoP = pred.shape
    P = twoP // 2
    px, py = pred[:, :P], pred[:, P:]
    tx, ty = truth[:, :P], truth[:, P:]
    total = 0.0
    for ix in range(P):
        dpx = px - px[:, ix:ix + 1]
        dtx = tx - tx[:, ix:ix + 1]
        total += jnp.sqrt(jnp.sum((dpx - dtx) ** 2))
        dpy = py - py[:, ix:ix + 1]
        dty = ty - ty[:, ix:ix + 1]
        total += jnp.sqrt(jnp.sum((dpy - dty) ** 2))
    return total / (B * 2.0)


if __name__ == "__main__":
    key = jax.random.PRNGKey(0)
    k1, k2 = jax.random.split(key)
    B, P = 4, 8  # pred/truth: (batch=4, 2*pointsNum=16)
    pred = jax.random.normal(k1, (B, 2 * P), dtype=jnp.float32)
    truth = jax.random.normal(k2, (B, 2 * P), dtype=jnp.float32)

    loss = gcs_loss(pred, truth)
    jax.block_until_ready(loss)

    ref = _gcs_loss_ref(pred, truth)
    assert jnp.allclose(loss, ref, rtol=1e-5, atol=1e-5), (loss, ref)

    # Also exercise a shape with a large, lane-dense feature axis + batch tiling.
    B2, P2 = 24, 128
    pred2 = jax.random.normal(k1, (B2, 2 * P2), dtype=jnp.float32) * 3.0 + 5.0
    truth2 = jax.random.normal(k2, (B2, 2 * P2), dtype=jnp.float32)
    loss2 = gcs_loss(pred2, truth2, block_batch=8)
    jax.block_until_ready(loss2)
    ref2 = _gcs_loss_ref(pred2, truth2)
    assert jnp.allclose(loss2, ref2, rtol=1e-4, atol=1e-4), (loss2, ref2)

    print("KERNEL_OK")
</pallas_src>

<mosaic_0001>
module attributes {stable_mosaic.version = 11 : i64} {
  func.func @_gcs_loss_kernel(%arg0: i32, %arg1: memref<4x16xf32, #tpu.memory_space<vmem>>, %arg2: memref<4x16xf32, #tpu.memory_space<vmem>>, %arg3: memref<1x1xf32, #tpu.memory_space<smem>>, %arg4: memref<1x8xf32, #tpu.memory_space<vmem>>, %arg5: memref<1x8xf32, #tpu.memory_space<vmem>>) attributes {dimension_semantics = [#tpu.dimension_semantics<arbitrary>], iteration_bounds = array<i64: 1>, scalar_prefetch = 0 : i64, scratch_operands = 2 : i64, tpu.core_type = #tpu.core_type<tc>, window_params = [{transform_indices = @transform_0, window_bounds = array<i64: 4, 16>}, {transform_indices = @transform_1, window_bounds = array<i64: 4, 16>}, {transform_indices = @transform_2, window_bounds = array<i64: 1, 1>}]} {
    %c0_i32 = arith.constant 0 : i32
    %0 = arith.cmpi eq, %arg0, %c0_i32 : i32
    %1 = arith.extui %0 : i1 to i32
    %c0_i32_0 = arith.constant 0 : i32
    %2 = arith.cmpi ne, %1, %c0_i32_0 : i32
    scf.if %2 {
      %cst_19 = arith.constant 0.000000e+00 : f32
      %35 = vector.broadcast %cst_19 : f32 to vector<1x8xf32>
      %c0_20 = arith.constant 0 : index
      %c0_21 = arith.constant 0 : index
      %36 = vector.load %arg4[%c0_20, %c0_21] : memref<1x8xf32, #tpu.memory_space<vmem>>, vector<1x8xf32>
      tpu.vector_store %arg4[%c0_20, %c0_21], %35 {strides = array<i32>} : memref<1x8xf32, #tpu.memory_space<vmem>>, vector<1x8xf32>,
      %cst_22 = arith.constant 0.000000e+00 : f32
      %37 = vector.broadcast %cst_22 : f32 to vector<1x8xf32>
      %c0_23 = arith.constant 0 : index
      %c0_24 = arith.constant 0 : index
      %38 = vector.load %arg5[%c0_23, %c0_24] : memref<1x8xf32, #tpu.memory_space<vmem>>, vector<1x8xf32>
      tpu.vector_store %arg5[%c0_23, %c0_24], %37 {strides = array<i32>} : memref<1x8xf32, #tpu.memory_space<vmem>>, vector<1x8xf32>,
    } else {
    }
    %c0 = arith.constant 0 : index
    %c0_1 = arith.constant 0 : index
    %3 = vector.load %arg1[%c0, %c0_1] : memref<4x16xf32, #tpu.memory_space<vmem>>, vector<4x16xf32>
    %c0_2 = arith.constant 0 : index
    %c0_3 = arith.constant 0 : index
    %4 = vector.load %arg2[%c0_2, %c0_3] : memref<4x16xf32, #tpu.memory_space<vmem>>, vector<4x16xf32>
    %5 = arith.subf %3, %4 : vector<4x16xf32>
    %6 = vector.extract_strided_slice %5 {offsets = [0, 0], sizes = [4, 8], strides = [1, 1]} : vector<4x16xf32> to vector<4x8xf32>
    %7 = vector.extract_strided_slice %5 {offsets = [0, 8], sizes = [4, 8], strides = [1, 1]} : vector<4x16xf32> to vector<4x8xf32>
    %cst = arith.constant dense<0.000000e+00> : vector<4xf32>
    %8 = vector.multi_reduction <add>, %6, %cst [1] : vector<4x8xf32> to vector<4xf32>
    %9 = vector.shape_cast %8 : vector<4xf32> to vector<4x1xf32>
    %cst_4 = arith.constant 1.250000e-01 : f32
    %10 = vector.broadcast %cst_4 : f32 to vector<4x1xf32>
    %11 = arith.mulf %9, %10 : vector<4x1xf32>
    %12 = vector.broadcast %11 : vector<4x1xf32> to vector<4x8xf32>
    %13 = arith.subf %6, %12 : vector<4x8xf32>
    %cst_5 = arith.constant dense<0.000000e+00> : vector<4xf32>
    %14 = vector.multi_reduction <add>, %7, %cst_5 [1] : vector<4x8xf32> to vector<4xf32>
    %15 = vector.shape_cast %14 : vector<4xf32> to vector<4x1xf32>
    %cst_6 = arith.constant 1.250000e-01 : f32
    %16 = vector.broadcast %cst_6 : f32 to vector<4x1xf32>
    %17 = arith.mulf %15, %16 : vector<4x1xf32>
    %18 = vector.broadcast %17 : vector<4x1xf32> to vector<4x8xf32>
    %19 = arith.subf %7, %18 : vector<4x8xf32>
    %c0_7 = arith.constant 0 : index
    %c0_8 = arith.constant 0 : index
    %20 = vector.load %arg4[%c0_7, %c0_8] : memref<1x8xf32, #tpu.memory_space<vmem>>, vector<1x8xf32>
    %21 = arith.mulf %13, %13 : vector<4x8xf32>
    %cst_9 = arith.constant dense<0.000000e+00> : vector<8xf32>
    %22 = vector.multi_reduction <add>, %21, %cst_9 [0] : vector<4x8xf32> to vector<8xf32>
    %23 = vector.shape_cast %22 : vector<8xf32> to vector<1x8xf32>
    %24 = arith.addf %20, %23 : vector<1x8xf32>
    %c0_10 = arith.constant 0 : index
    %c0_11 = arith.constant 0 : index
    %25 = vector.load %arg4[%c0_10, %c0_11] : memref<1x8xf32, #tpu.memory_space<vmem>>, vector<1x8xf32>
    tpu.vector_store %arg4[%c0_10, %c0_11], %24 {strides = array<i32>} : memref<1x8xf32, #tpu.memory_space<vmem>>, vector<1x8xf32>,
    %c0_12 = arith.constant 0 : index
    %c0_13 = arith.constant 0 : index
    %26 = vector.load %arg5[%c0_12, %c0_13] : memref<1x8xf32, #tpu.memory_space<vmem>>, vector<1x8xf32>
    %27 = arith.mulf %19, %19 : vector<4x8xf32>
    %cst_14 = arith.constant dense<0.000000e+00> : vector<8xf32>
    %28 = vector.multi_reduction <add>, %27, %cst_14 [0] : vector<4x8xf32> to vector<8xf32>
    %29 = vector.shape_cast %28 : vector<8xf32> to vector<1x8xf32>
    %30 = arith.addf %26, %29 : vector<1x8xf32>
    %c0_15 = arith.constant 0 : index
    %c0_16 = arith.constant 0 : index
    %31 = vector.load %arg5[%c0_15, %c0_16] : memref<1x8xf32, #tpu.memory_space<vmem>>, vector<1x8xf32>
    tpu.vector_store %arg5[%c0_15, %c0_16], %30 {strides = array<i32>} : memref<1x8xf32, #tpu.memory_space<vmem>>, vector<1x8xf32>,
    %c0_i32_17 = arith.constant 0 : i32
    %32 = arith.cmpi eq, %arg0, %c0_i32_17 : i32
    %33 = arith.extui %32 : i1 to i32
    %c0_i32_18 = arith.constant 0 : i32
    %34 = arith.cmpi ne, %33, %c0_i32_18 : i32
    scf.if %34 {
      %c0_19 = arith.constant 0 : index
      %c0_20 = arith.constant 0 : index
      %35 = vector.load %arg4[%c0_19, %c0_20] : memref<1x8xf32, #tpu.memory_space<vmem>>, vector<1x8xf32>
      %c0_21 = arith.constant 0 : index
      %c0_22 = arith.constant 0 : index
      %36 = vector.load %arg5[%c0_21, %c0_22] : memref<1x8xf32, #tpu.memory_space<vmem>>, vector<1x8xf32>
      %37 = vector.shape_cast %35 : vector<1x8xf32> to vector<1x1x8xf32>
      %cst_23 = arith.constant dense<0.000000e+00> : vector<1xf32>
      %38 = vector.multi_reduction <add>, %37, %cst_23 [1, 2] : vector<1x1x8xf32> to vector<1xf32>
      %39 = vector.shape_cast %38 : vector<1xf32> to vector<1x1x1xf32>
      %40 = vector.extract %39[0, 0, 0] : f32 from vector<1x1x1xf32>
      %41 = vector.shape_cast %36 : vector<1x8xf32> to vector<1x1x8xf32>
      %cst_24 = arith.constant dense<0.000000e+00> : vector<1xf32>
      %42 = vector.multi_reduction <add>, %41, %cst_24 [1, 2] : vector<1x1x8xf32> to vector<1xf32>
      %43 = vector.shape_cast %42 : vector<1xf32> to vector<1x1x1xf32>
      %44 = vector.extract %43[0, 0, 0] : f32 from vector<1x1x1xf32>
      %cst_25 = arith.constant 8.000000e+00 : f32
      %45 = vector.broadcast %cst_25 : f32 to vector<1x8xf32>
      %46 = arith.mulf %45, %35 : vector<1x8xf32>
      %47 = vector.broadcast %40 : f32 to vector<1x8xf32>
      %48 = arith.addf %47, %46 : vector<1x8xf32>
      %49 = math.sqrt %48 : vector<1x8xf32>
      %50 = vector.shape_cast %49 : vector<1x8xf32> to vector<1x1x8xf32>
      %cst_26 = arith.constant dense<0.000000e+00> : vector<1xf32>
      %51 = vector.multi_reduction <add>, %50, %cst_26 [1, 2] : vector<1x1x8xf32> to vector<1xf32>
      %52 = vector.shape_cast %51 : vector<1xf32> to vector<1x1x1xf32>
      %53 = vector.extract %52[0, 0, 0] : f32 from vector<1x1x1xf32>
      %cst_27 = arith.constant 8.000000e+00 : f32
      %54 = vector.broadcast %cst_27 : f32 to vector<1x8xf32>
      %55 = arith.mulf %54, %36 : vector<1x8xf32>
      %56 = vector.broadcast %44 : f32 to vector<1x8xf32>
      %57 = arith.addf %56, %55 : vector<1x8xf32>
      %58 = math.sqrt %57 : vector<1x8xf32>
      %59 = vector.shape_cast %58 : vector<1x8xf32> to vector<1x1x8xf32>
      %cst_28 = arith.constant dense<0.000000e+00> : vector<1xf32>
      %60 = vector.multi_reduction <add>, %59, %cst_28 [1, 2] : vector<1x1x8xf32> to vector<1xf32>
      %61 = vector.shape_cast %60 : vector<1xf32> to vector<1x1x1xf32>
      %62 = vector.extract %61[0, 0, 0] : f32 from vector<1x1x1xf32>
      %63 = arith.addf %53, %62 : f32
      %cst_29 = arith.constant 8.000000e+00 : f32
      %64 = arith.divf %63, %cst_29 : f32
      %c0_30 = arith.constant 0 : index
      %c0_31 = arith.constant 0 : index
      %65 = memref.load %arg3[%c0_30, %c0_31] : memref<1x1xf32, #tpu.memory_space<smem>>
      memref.store %64, %arg3[%c0_30, %c0_31] : memref<1x1xf32, #tpu.memory_space<smem>>
    } else {
    }
    return
  }
  func.func @transform_0(%arg0: i32) -> (i32, i32) {
    %c0_i32 = arith.constant 0 : i32
    %c0_i32_0 = arith.constant 0 : i32
    return %arg0, %c0_i32 : i32, i32
  }
  func.func @transform_1(%arg0: i32) -> (i32, i32) {
    %c0_i32 = arith.constant 0 : i32
    %c0_i32_0 = arith.constant 0 : i32
    return %arg0, %c0_i32 : i32, i32
  }
  func.func @transform_2(%arg0: i32) -> (i32, i32) {
    %c0_i32 = arith.constant 0 : i32
    %c0_i32_0 = arith.constant 0 : i32
    %c0_i32_1 = arith.constant 0 : i32
    return %c0_i32, %c0_i32_0 : i32, i32
  }
}

</mosaic_0001>

<bundles_post_ra>
// kernel: tpu_custom_call.1
= control target key start
LH: loop header
LB: loop body
LE: loop exit
PB: predicated region body
PF: predicated region fallthrough
CT: control target
= control target key end

     0   :  { %7 = vsyncpa [#allocation5], 0  ;;  %s337_s0 = inlined_call_operand.hbm [shape: f32[4,16], index: 0, kind: input, shape index: {}]   ;;  %s338_s1 = inlined_call_operand.hbm [shape: f32[4,16], index: 1, kind: input, shape index: {}]   ;;  %s339_s2 = inlined_call_operand.hbm [shape: f32[1,1], index: 2, kind: output, shape index: {}]  }
   0x1   :  { %8 = vsyncpa [#allocation8], 0 }
   0x2   :  { %9 = vsyncpa [#allocation6], 0  ;;  %s267_s9 = smov [#allocation4]   ;;  %s268_s11 = smov [#allocation7]  }
   0x3   :  { %s16_s10 = sshll.u32 %s267_s9, 4  ;;  %s26_s12 = sshll.u32 %s268_s11, 4  ;;  %s17_s10 = int_to_ptr.vmem [resolvable:$true] %s16_s10  ;;  %s27_s12 = int_to_ptr.vmem [resolvable:$true] %s26_s12 }
   0x4   :  { %s207_s15 = scalar_lea.hbm %s337_s0, 64 }
   0x5   :  { %p208_p0 = scmp.ne.s32.totalorder %s337_s0, %s207_s15  ;;  %p211_p1 = scmp.lt.u32.totalorder %s207_s15, %s337_s0 }
   0x7   :  { %p213_p2 = pnand %p211_p1, %p208_p0 }
   0x9   :  { %216 = shalt.err (!%p213_p2)
}
   0xa   :  { %s217_s20 = scalar_lea.vmem %s17_s10, 64  ;;  %p222_p4 = scmp.lt.s32.totalorder %s17_s10, %s17_s10 }
   0xb   :  { %p218_p3 = scmp.ne.s32.totalorder %s17_s10, %s217_s20  ;;  %p223_p5 = scmp.lt.s32.totalorder %s217_s20, %s217_s20 }
   0xd   :  { %p224_p6 = por %p223_p5, %p222_p4 }
   0xf   :  { %p225_p7 = pnand %p224_p6, %p218_p3 }
  0x11   :  { %228 = shalt.err (!%p225_p7)
}
  0x12   :  { %19 = dma.hbm_to_vmem [thread:$0]  %s337_s0, 64, %s17_s10, [#allocation5]  }
  0x13   :  { %s229_s25 = scalar_lea.hbm %s338_s1, 64 }
  0x14   :  { %p230_p8 = scmp.ne.s32.totalorder %s338_s1, %s229_s25  ;;  %p233_p9 = scmp.lt.u32.totalorder %s229_s25, %s338_s1 }
  0x16   :  { %p235_p10 = pnand %p233_p9, %p230_p8 }
  0x18   :  { %238 = shalt.err (!%p235_p10)
}
  0x19   :  { %s239_s30 = scalar_lea.vmem %s27_s12, 64  ;;  %p244_p12 = scmp.lt.s32.totalorder %s27_s12, %s27_s12 }
  0x1a   :  { %p240_p11 = scmp.ne.s32.totalorder %s27_s12, %s239_s30  ;;  %p245_p13 = scmp.lt.s32.totalorder %s239_s30, %s239_s30 }
  0x1c   :  { %p246_p0 = por %p245_p13, %p244_p12 }
  0x1e   :  { %p247_p1 = pnand %p246_p0, %p240_p11 }
  0x20   :  { %250 = shalt.err (!%p247_p1)
}
  0x21   :  { %29 = dma.hbm_to_vmem [thread:$0]  %s338_s1, 64, %s27_s12, [#allocation8]  }
  0x22   :  { %261 = dma.done.wait [#allocation5], 64  }
  0x23   :  { %262 = vsyncadd [#allocation5], 4294967232 }
  0x24   :  { %263 = dma.done.wait [#allocation8], 64  }
  0x25   :  { %264 = vsyncadd [#allocation8], 4294967232  ;;  %v43_v0 = vld [vmem:[#allocation4] sm:$0xf]  ;;  %v44_v1 = vld [vmem:[#allocation7] sm:$0xf]  ;;  %v87_v28 = vlaneseq }
  0x26   :  { %v45_v2 = vsub.f32 %v43_v0, %v44_v1  ;;  %vm46_vm0 = vcmask 60416   ;;  %s269_s4 = smov 120   ;;  %vm40_vm1 = vcmask 57344   ;;  %v270_v7 = vmov 0.0   ;;  %s251_s12 = scalar_lea.hbm %s339_s2, 16 }
  0x27   :  { %41 = vst.msk [vmem:[#allocation2] sm:$0x1] %vm40_vm1, %v270_v7  ;;  %42 = vst.msk [vmem:[#allocation3] sm:$0x1] %vm40_vm1, %v270_v7  ;;  %vm75_vm2 = vcmask 126016   ;;  %v88_v32 = vshrl.u32 %v87_v28, 7  ;;  %p252_p2 = scmp.ne.s32.totalorder %s339_s2, %s251_s12  ;;  %p255_p3 = scmp.lt.u32.totalorder %s251_s12, %s339_s2 }
  0x28   :  { %53 = vrot.lane.b32.xlu0 %v45_v2, %s269_s4  ;;  %v47_v3 = vsel %vm46_vm0, %v45_v2, 0.0  ;;  %v271_v26 = vmov 1966171168  }
  0x29   :  { %48 = vadd.xlane.f32.xlu1 %v47_v3  ;;  %v85_v27 = vunpack.c.l.s4 %v271_v26  ;;  %p257_p4 = pnand %p255_p3, %p252_p2 }
  0x2b   :  { %v86_v31 = vunpack.c.0.s8 %v85_v27 }
  0x2d   :  { %v89_v35 = vsub.s32 %v86_v31, %v88_v32 }
  0x2e   :  { %v61_v17 = vld [vmem:[#allocation2] sm:$0x1]  ;;  %v73_v41 = vld [vmem:[#allocation3] sm:$0x1] }
  0x9a   :  { %v54_v4 = vpop.permute.xlu0 %53 }
  0x9b   :  { %v56_v5 = vsel %vm46_vm0, %v54_v4, 0.0 }
  0x9c   :  { %57 = vadd.xlane.f32.xlu0 %v56_v5 }
  0xb6   :  { %v49_v6 = vpop.xlane.xlu1 %48 }
  0xb7   :  { %v50_v8 = vmul.f32 0.125, %v49_v6 }
  0xb9   :  { %v51_v9 = vsub.f32 %v45_v2, %v50_v8 }
  0xbb   :  { %v62_v10 = vmul.f32 %v51_v9, %v51_v9 }
  0xbd   :  { %v63_v11 = vsel %vm46_vm0, %v62_v10, 0.0 }
  0xbe   :  { %v64_v12 = vrot.slane %v63_v11, 4 }
  0xc0   :  { %v65_v13 = vadd.f32 %v64_v12, %v63_v11 }
  0xc2   :  { %v66_v14 = vrot.slane %v65_v13, 2 }
  0xc4   :  { %v67_v15 = vadd.f32 %v66_v14, %v65_v13 }
  0xc6   :  { %v68_v16 = vrot.slane %v67_v15, 1 }
  0xc8   :  { %v69_v18 = vadd.f32 %v68_v16, %v67_v15 }
  0xca   :  { %v70_v19 = vadd.f32 %v69_v18, %v61_v17 }
  0xcc   :  { %72 = vst.msk [vmem:[#allocation2] sm:$0x1] %vm40_vm1, %v70_v19 }
  0xd3   :  { %v106_v39 = vld [vmem:[#allocation2] sm:$0x1] }
  0xd4   :  { %v108_v40 = vsel %vm40_vm1, %v106_v39, 0.0  ;;  %v128_v53 = vmul.f32 8.0, %v106_v39 }
 0x129   :  { %v58_v20 = vpop.xlane.xlu0 %57 }
 0x12a   :  { %v59_v21 = vmul.f32 0.125, %v58_v20 }
 0x12c   :  { %v60_v22 = vsub.f32 %v45_v2, %v59_v21 }
 0x12e   :  { %v74_v23 = vmul.f32 %v60_v22, %v60_v22 }
 0x130   :  { %v76_v24 = vsel %vm75_vm2, %v74_v23, 0.0 }
 0x131   :  { %v77_v25 = vrot.slane %v76_v24, 4 }
 0x133   :  { %v78_v29 = vadd.f32 %v77_v25, %v76_v24 }
 0x135   :  { %v79_v30 = vrot.slane %v78_v29, 2 }
 0x137   :  { %v80_v33 = vadd.f32 %v79_v30, %v78_v29 }
 0x139   :  { %v81_v34 = vrot.slane %v80_v33, 1 }
 0x13b   :  { %v82_v36 = vadd.f32 %v81_v34, %v80_v33 }
 0x13d   :  { %v90_v37 = vrot.slane %v82_v36, %v89_v35 }
 0x13f   :  { %v97_v38 = vrot.slane %v90_v37, %v89_v35 }
 0x141   :  { %98 = vrot.lane.b32.xlu1 %v97_v38, %s269_s4 }
 0x165   :  { %109 = vadd.xlane.f32.xlu1 %v108_v40 }
 0x1b3   :  { %v99_v42 = vpop.permute.xlu1 %98 }
 0x1b4   :  { %v101_v43 = vadd.f32 %v99_v42, %v73_v41 }
 0x1b6   :  { %102 = vst.msk [vmem:[#allocation3] sm:$0x1] %vm40_vm1, %v101_v43 }
 0x1bd   :  { %v107_v44 = vld [vmem:[#allocation3] sm:$0x1] }
 0x1be   :  { %v118_v45 = vsel %vm40_vm1, %v107_v44, 0.0  ;;  %v148_v5 = vmul.f32 8.0, %v107_v44 }
 0x1bf   :  { %119 = vadd.xlane.f32.xlu0 %v118_v45 }
 0x1f2   :  { %v110_v46 = vpop.xlane.xlu1 %109 }
 0x1f3   :  { %v111_v47 = vrot.slane %v110_v46, 4 }
 0x1f5   :  { %v112_v48 = vadd.f32 %v111_v47, %v110_v46 }
 0x1f7   :  { %v113_v49 = vrot.slane %v112_v48, 2 }
 0x1f9   :  { %v114_v50 = vadd.f32 %v113_v49, %v112_v48 }
 0x1fb   :  { %v115_v51 = vrot.slane %v114_v50, 1 }
 0x1fd   :  { %v116_v52 = vadd.f32 %v115_v51, %v114_v50 }
 0x1ff   :  { %189 = vpush %v116_v52 }
 0x230   :  { %s190_s1 = spop %189 }
 0x231   :  { %v129_v54 = vstv %s190_s1 }
 0x232   :  { %v130_v55 = vadd.f32 %v129_v54, %v128_v53 }
 0x234   :  { %203 = vrsqrt.f32 %v130_v55  ;;  %vm133_vm3 = vcmp.eq.f32.partialorder %v130_v55, inf  ;;  %v136_v58 = vand.u32 2147483648, %v130_v55  ;;  %vm135_vm4 = vcmp.eq.f32.partialorder %v130_v55, 0.0 }
 0x23e   :  { %v204_v56 = vpop.eup %203 }
 0x23f   :  { %v132_v57 = vmul.f32 %v204_v56, %v130_v55 }
 0x241   :  { %v134_v59 = vsel %vm133_vm3, %v130_v55, %v132_v57 }
 0x242   :  { %v137_v60 = vsel %vm135_vm4, %v136_v58, %v134_v59 }
 0x243   :  { %v138_v61 = vsel %vm40_vm1, %v137_v60, 0.0 }
 0x244   :  { %139 = vadd.xlane.f32.xlu0 %v138_v61 }
 0x24c   :  { %v120_v62 = vpop.xlane.xlu0 %119 }
 0x24d   :  { %v121_v63 = vrot.slane %v120_v62, 4 }
 0x24f   :  { %v122_v0 = vadd.f32 %v121_v63, %v120_v62 }
 0x251   :  { %v123_v1 = vrot.slane %v122_v0, 2 }
 0x253   :  { %v124_v2 = vadd.f32 %v123_v1, %v122_v0 }
 0x255   :  { %v125_v3 = vrot.slane %v124_v2, 1 }
 0x257   :  { %v126_v4 = vadd.f32 %v125_v3, %v124_v2 }
 0x259   :  { %191 = vpush %v126_v4 }
 0x28a   :  { %s192_s5 = spop %191 }
 0x28b   :  { %v149_v6 = vstv %s192_s5 }
 0x28c   :  { %v150_v7 = vadd.f32 %v149_v6, %v148_v5 }
 0x28e   :  { %205 = vrsqrt.f32 %v150_v7  ;;  %vm153_vm5 = vcmp.eq.f32.partialorder %v150_v7, inf  ;;  %v156_v10 = vand.u32 2147483648, %v150_v7  ;;  %vm155_vm6 = vcmp.eq.f32.partialorder %v150_v7, 0.0 }
 0x298   :  { %v206_v8 = vpop.eup %205 }
 0x299   :  { %v152_v9 = vmul.f32 %v206_v8, %v150_v7 }
 0x29b   :  { %v154_v11 = vsel %vm153_vm5, %v150_v7, %v152_v9 }
 0x29c   :  { %v157_v12 = vsel %vm155_vm6, %v156_v10, %v154_v11 }
 0x29d   :  { %v158_v13 = vsel %vm40_vm1, %v157_v12, 0.0 }
 0x29e   :  { %159 = vadd.xlane.f32.xlu0 %v158_v13 }
 0x2d1   :  { %v140_v14 = vpop.xlane.xlu0 %139 }
 0x2d2   :  { %v141_v15 = vrot.slane %v140_v14, 4 }
 0x2d4   :  { %v142_v16 = vadd.f32 %v141_v15, %v140_v14 }
 0x2d6   :  { %v143_v17 = vrot.slane %v142_v16, 2 }
 0x2d8   :  { %v144_v18 = vadd.f32 %v143_v17, %v142_v16 }
 0x2da   :  { %v145_v19 = vrot.slane %v144_v18, 1 }
 0x2dc   :  { %v146_v20 = vadd.f32 %v145_v19, %v144_v18 }
 0x2de   :  { %193 = vpush %v146_v20 }
 0x30f   :  { %s194_s6 = spop %193 }
 0x32b   :  { %v160_v21 = vpop.xlane.xlu0 %159 }
 0x32c   :  { %v161_v22 = vrot.slane %v160_v21, 4 }
 0x32e   :  { %v162_v23 = vadd.f32 %v161_v22, %v160_v21 }
 0x330   :  { %v163_v24 = vrot.slane %v162_v23, 2 }
 0x332   :  { %v164_v25 = vadd.f32 %v163_v24, %v162_v23 }
 0x334   :  { %v165_v26 = vrot.slane %v164_v25, 1 }
 0x336   :  { %v166_v27 = vadd.f32 %v165_v26, %v164_v25 }
 0x338   :  { %195 = vpush %v166_v27 }
 0x369   :  { %s196_s7 = spop %195 }
 0x36a   :  { %s168_s8 = sadd.f32 %s196_s7, %s194_s6 }
 0x36c   :  { %s171_s9 = smul.f32 0.125, %s168_s8 }
 0x36e   :  { %173 = sst [smem:[#allocation9]] %s171_s9 }
 0x36f   :  { %260 = shalt.err (!%p257_p4)
}
 0x370   :  { %s272_s17 = smov [#allocation9]  }
 0x371   :  { %181 = dma.smem_to_hbm %s272_s17, 16, %s339_s2, [#allocation6]  }
 0x372   :  { %265 = dma.done.wait [#allocation6], 16  }
 0x373   :  { %266 = vsyncadd [#allocation6], 4294967280 }
 0x374   :  { %185 = sfence }
 0x375   :  { %186 = vsyncpa [#allocation5], 1 }
 0x376   :  { %187 = vsyncpa [#allocation8], 1 }
 0x377   :  { %188 = vsyncpa [#allocation6], 1 }

</bundles_post_ra>
